<compile_context>
chip_gen: v5e
topology: v5e:2x2
jax: 0.10.0
libtpu: 0.0.40
codegen_flags: <defaults>
</compile_context>

<pallas_src>
import functools

import jax
import jax.numpy as jnp
import numpy as np
from jax import lax
from jax.experimental import pallas as pl
from jax.experimental.pallas import tpu as pltpu


# -----------------------------------------------------------------------------
# Kernel 1: hoisted input projection, parallel over time chunks.
#   x rows are laid out time-major: row t*B + b.
# -----------------------------------------------------------------------------
def _input_proj_kernel(x_ref, wih_ref, bih_ref, gi_ref, *, mxu_dtype):
    x = x_ref[...].astype(mxu_dtype)          # (time_chunk*B, D)
    w = wih_ref[...].astype(mxu_dtype)        # (D, 3H)
    gi_ref[...] = (jnp.dot(x, w, preferred_element_type=jnp.float32)
                   + bih_ref[...])            # (time_chunk*B, 3H), fp32


# -----------------------------------------------------------------------------
# Kernel 2: the recurrence. One grid step == `time_chunk` GRU time steps.
# Hidden state lives in a VMEM scratch that persists across grid iterations.
# -----------------------------------------------------------------------------
def _gru_recurrence_kernel(lens_ref, gi_ref, whh_ref, bhn_ref, out_ref, h_ref,
                           *, hidden_size, time_chunk, mxu_dtype):
    c = pl.program_id(0)
    H = hidden_size

    @pl.when(c == 0)
    def _():
        h_ref[...] = jnp.zeros_like(h_ref)

    whh = whh_ref[...].astype(mxu_dtype)      # (H, 3H), loop invariant
    bhn = bhn_ref[...]                        # (1, H), loop invariant (n-gate bias)
    # Remaining valid steps for this chunk, per sample: valid iff i < rem[b].
    rem = lens_ref[...] - c * time_chunk      # (B, 1) int32

    def step(i, carry):
        h_prev = h_ref[...]                   # (B, H)
        gi = gi_ref[i]                        # (B, 3H)  precomputed x_t @ W_ih^T + biases
        gh = jnp.dot(h_prev.astype(mxu_dtype), whh,
                     preferred_element_type=jnp.float32)        # (B, 3H), no bias

        # Gate order r, z, n (PyTorch GRU); all element-wise math in fp32.
        # b_hr / b_hz were folded into gi in pass 1; only b_hn is added here.
        r = jax.nn.sigmoid(gi[:, 0 * H:1 * H] + gh[:, 0 * H:1 * H])
        z = jax.nn.sigmoid(gi[:, 1 * H:2 * H] + gh[:, 1 * H:2 * H])
        n = jnp.tanh(gi[:, 2 * H:3 * H] + r * (gh[:, 2 * H:3 * H] + bhn))
        h_new = n + z * (h_prev - n)          # == (1-z)*n + z*h_prev

        # Packed-sequence masking: samples with t >= len[b] freeze h and emit zeros.
        valid = i < rem                       # (B, 1) bool, broadcasts over H
        h_ref[...] = jnp.where(valid, h_new, h_prev)
        out_ref[i] = jnp.where(valid, h_new, 0.0)
        return carry

    lax.fori_loop(0, time_chunk, step, 0, unroll=True)


# -----------------------------------------------------------------------------
# Wrapper: batch_first (B, T, D) in, (B, max(x_len), H) out — like the module.
# -----------------------------------------------------------------------------
def gru_forward(x, x_len, w_ih, w_hh, b_ih, b_hh, *, time_chunk=16,
                mxu_dtype=jnp.float32):
    B, T, D = x.shape
    H = w_hh.shape[1]
    assert w_ih.shape == (3 * H, D) and w_hh.shape == (3 * H, H)

    # Lengths are host-visible (same as the PyTorch call), so max length is static.
    x_len_np = np.asarray(x_len)
    t_out = int(x_len_np.max())
    time_chunk = max(1, min(int(time_chunk), t_out))
    n_chunks = -(-t_out // time_chunk)        # cdiv
    t_pad = n_chunks * time_chunk

    x = x.astype(jnp.float32)
    # TODO(synk): input dropout (p=0.2) treated as identity (eval-mode semantics).

    # Time-major, trimmed to t_out, zero-padded to a multiple of time_chunk, then
    # flattened to rows (row index = t*B + b) so the projection is one big GEMM.
    x_tm = jnp.transpose(x[:, :t_out, :], (1, 0, 2))                # (t_out, B, D)
    if t_pad != t_out:
        x_tm = jnp.pad(x_tm, ((0, t_pad - t_out), (0, 0), (0, 0)))
    x_rows = x_tm.reshape(t_pad * B, D)

    lens = jnp.asarray(x_len, jnp.int32).reshape(B, 1)
    wih_t = jnp.transpose(w_ih).astype(jnp.float32)                 # (D, 3H)
    whh_t = jnp.transpose(w_hh).astype(jnp.float32)                 # (H, 3H)

    # Fold the r/z parts of b_hh into the input-projection bias (valid because
    # r = sigmoid(.. + b_ir + .. + b_hr) etc.); b_hn must stay inside r*(...).
    b_ih = b_ih.astype(jnp.float32)
    b_hh = b_hh.astype(jnp.float32)
    bih_eff = jnp.concatenate([b_ih[:2 * H] + b_hh[:2 * H], b_ih[2 * H:]])
    bih_eff = bih_eff.reshape(1, 3 * H)
    bhn = b_hh[2 * H:3 * H].reshape(1, H)

    rows_per_chunk = time_chunk * B

    # ---- Pass 1: hoisted input projection (parallel over time chunks). ----
    gi_rows = pl.pallas_call(
        functools.partial(_input_proj_kernel, mxu_dtype=mxu_dtype),
        out_shape=jax.ShapeDtypeStruct((t_pad * B, 3 * H), jnp.float32),
        grid_spec=pltpu.PrefetchScalarGridSpec(
            num_scalar_prefetch=0,
            grid=(n_chunks,),
            in_specs=[
                pl.BlockSpec((rows_per_chunk, D), lambda c: (c, 0)),   # x rows
                pl.BlockSpec((D, 3 * H), lambda c: (0, 0)),            # W_ih^T
                pl.BlockSpec((1, 3 * H), lambda c: (0, 0)),            # b_ih (+ b_hh[rz])
            ],
            out_specs=pl.BlockSpec((rows_per_chunk, 3 * H), lambda c: (c, 0)),
        ),
        compiler_params=pltpu.CompilerParams(
            dimension_semantics=("parallel",),
        ),
    )(x_rows, wih_t, bih_eff)

    gi = gi_rows.reshape(t_pad, B, 3 * H)     # contiguous reshape (free in HBM)

    # ---- Pass 2: sequential recurrence, `time_chunk` steps per grid step. ----
    out_tm = pl.pallas_call(
        functools.partial(_gru_recurrence_kernel, hidden_size=H,
                          time_chunk=time_chunk, mxu_dtype=mxu_dtype),
        out_shape=jax.ShapeDtypeStruct((t_pad, B, H), jnp.float32),
        grid_spec=pltpu.PrefetchScalarGridSpec(
            num_scalar_prefetch=0,
            grid=(n_chunks,),
            in_specs=[
                pl.BlockSpec((B, 1), lambda c: (0, 0)),                      # lens
                pl.BlockSpec((time_chunk, B, 3 * H), lambda c: (c, 0, 0)),   # gi chunk
                pl.BlockSpec((H, 3 * H), lambda c: (0, 0)),                  # W_hh^T
                pl.BlockSpec((1, H), lambda c: (0, 0)),                      # b_hn
            ],
            out_specs=pl.BlockSpec((time_chunk, B, H), lambda c: (c, 0, 0)),
            scratch_shapes=[pltpu.VMEM((B, H), jnp.float32)],                # hidden carry
        ),
        compiler_params=pltpu.CompilerParams(
            dimension_semantics=("arbitrary",),       # true recurrence across chunks
        ),
    )(lens, gi, whh_t, bhn)

    out = jnp.transpose(out_tm, (1, 0, 2))[:, :t_out, :]            # (B, t_out, H)
    return out


# -----------------------------------------------------------------------------
# Pure-JAX reference of the same packed-GRU semantics (for validation).
# Uses the textbook PyTorch formulation with *separate* biases, so it also
# validates the bias-folding done in the Pallas path.
# -----------------------------------------------------------------------------
def _gru_reference(x, x_len, w_ih, w_hh, b_ih, b_hh):
    B, T, D = x.shape
    H = w_hh.shape[1]
    lens = jnp.asarray(x_len, jnp.int32)

    def step(h, inp):
        x_t, t = inp
        gi = x_t @ w_ih.T + b_ih
        gh = h @ w_hh.T + b_hh
        r = jax.nn.sigmoid(gi[:, :H] + gh[:, :H])
        z = jax.nn.sigmoid(gi[:, H:2 * H] + gh[:, H:2 * H])
        n = jnp.tanh(gi[:, 2 * H:] + r * gh[:, 2 * H:])
        h_new = (1.0 - z) * n + z * h
        valid = (t < lens)[:, None]
        return jnp.where(valid, h_new, h), jnp.where(valid, h_new, 0.0)

    h0 = jnp.zeros((B, H), jnp.float32)
    _, outs = lax.scan(step, h0, (jnp.transpose(x, (1, 0, 2)), jnp.arange(T)))
    out = jnp.transpose(outs, (1, 0, 2))
    return out[:, :int(np.max(np.asarray(x_len))), :]


if __name__ == "__main__":
    # Small shapes consistent with the module: batch=2, seq=8, input_size=16, hidden=32.
    B, T, D, H = 2, 8, 16, 32
    key = jax.random.PRNGKey(0)
    kx, k1, k2, k3, k4 = jax.random.split(key, 5)

    x = jax.random.normal(kx, (B, T, D), dtype=jnp.float32)
    x_len = np.array([8, 5], dtype=np.int32)   # per-sample lengths, like x_len in PyTorch

    # PyTorch-style uniform(-1/sqrt(H), 1/sqrt(H)) GRU parameters, gate order r,z,n.
    bound = 1.0 / np.sqrt(H)
    w_ih = jax.random.uniform(k1, (3 * H, D), jnp.float32, -bound, bound)
    w_hh = jax.random.uniform(k2, (3 * H, H), jnp.float32, -bound, bound)
    b_ih = jax.random.uniform(k3, (3 * H,), jnp.float32, -bound, bound)
    b_hh = jax.random.uniform(k4, (3 * H,), jnp.float32, -bound, bound)

    out = jax.block_until_ready(gru_forward(x, x_len, w_ih, w_hh, b_ih, b_hh))
    ref = jax.block_until_ready(_gru_reference(x, x_len, w_ih, w_hh, b_ih, b_hh))

    np.testing.assert_allclose(np.asarray(out), np.asarray(ref), rtol=1e-5, atol=1e-5)
    assert out.shape == (B, int(np.max(x_len)), H)

    print("KERNEL_OK")
</pallas_src>

<mosaic_0001>
module attributes {stable_mosaic.version = 11 : i64} {
  func.func @_input_proj_kernel(%arg0: i32, %arg1: memref<16x16xf32, #tpu.memory_space<vmem>>, %arg2: memref<16x96xf32, #tpu.memory_space<vmem>>, %arg3: memref<1x96xf32, #tpu.memory_space<vmem>>, %arg4: memref<16x96xf32, #tpu.memory_space<vmem>>) attributes {dimension_semantics = [#tpu.dimension_semantics<parallel>], iteration_bounds = array<i64: 1>, scalar_prefetch = 0 : i64, scratch_operands = 0 : i64, tpu.core_type = #tpu.core_type<tc>, window_params = [{transform_indices = @transform_0, window_bounds = array<i64: 16, 16>}, {pipeline_mode = #tpu.pipeline_mode<synchronous>, transform_indices = @transform_1, window_bounds = array<i64: 16, 96>}, {pipeline_mode = #tpu.pipeline_mode<synchronous>, transform_indices = @transform_2, window_bounds = array<i64: 1, 96>}, {transform_indices = @transform_3, window_bounds = array<i64: 16, 96>}]} {
    %c0 = arith.constant 0 : index
    %c0_0 = arith.constant 0 : index
    %0 = vector.load %arg1[%c0, %c0_0] : memref<16x16xf32, #tpu.memory_space<vmem>>, vector<16x16xf32>
    %c0_1 = arith.constant 0 : index
    %c0_2 = arith.constant 0 : index
    %1 = vector.load %arg2[%c0_1, %c0_2] : memref<16x96xf32, #tpu.memory_space<vmem>>, vector<16x96xf32>
    %cst = arith.constant dense<0.000000e+00> : vector<16x96xf32>
    %2 = tpu.matmul %0, %1, %cst {dimension_numbers = #tpu.dot_dimension_numbers<[1], [0], [0], [1], [0, 0, 1, 1], [], []>} : vector<16x16xf32>, vector<16x96xf32>, vector<16x96xf32> -> vector<16x96xf32>
    %c0_3 = arith.constant 0 : index
    %c0_4 = arith.constant 0 : index
    %3 = vector.load %arg3[%c0_3, %c0_4] : memref<1x96xf32, #tpu.memory_space<vmem>>, vector<1x96xf32>
    %4 = vector.broadcast %3 : vector<1x96xf32> to vector<16x96xf32>
    %5 = arith.addf %2, %4 : vector<16x96xf32>
    %c0_5 = arith.constant 0 : index
    %c0_6 = arith.constant 0 : index
    %6 = vector.load %arg4[%c0_5, %c0_6] : memref<16x96xf32, #tpu.memory_space<vmem>>, vector<16x96xf32>
    tpu.vector_store %arg4[%c0_5, %c0_6], %5 {strides = array<i32>} : memref<16x96xf32, #tpu.memory_space<vmem>>, vector<16x96xf32>,
    return
  }
  func.func @transform_0(%arg0: i32) -> (i32, i32) {
    %c0_i32 = arith.constant 0 : i32
    %c0_i32_0 = arith.constant 0 : i32
    return %arg0, %c0_i32 : i32, i32
  }
  func.func @transform_1(%arg0: i32) -> (i32, i32) {
    %c0_i32 = arith.constant 0 : i32
    %c0_i32_0 = arith.constant 0 : i32
    %c0_i32_1 = arith.constant 0 : i32
    return %c0_i32, %c0_i32_0 : i32, i32
  }
  func.func @transform_2(%arg0: i32) -> (i32, i32) {
    %c0_i32 = arith.constant 0 : i32
    %c0_i32_0 = arith.constant 0 : i32
    %c0_i32_1 = arith.constant 0 : i32
    return %c0_i32, %c0_i32_0 : i32, i32
  }
  func.func @transform_3(%arg0: i32) -> (i32, i32) {
    %c0_i32 = arith.constant 0 : i32
    %c0_i32_0 = arith.constant 0 : i32
    return %arg0, %c0_i32 : i32, i32
  }
}

</mosaic_0001>

<bundles_post_ra>
// kernel: tpu_custom_call.1
= control target key start
LH: loop header
LB: loop body
LE: loop exit
PB: predicated region body
PF: predicated region fallthrough
CT: control target
= control target key end

     0   :  { %8 = vsyncpa [#allocation3], 0  ;;  %s242_s0 = inlined_call_operand.hbm [shape: f32[16,16], index: 0, kind: input, shape index: {}]   ;;  %s243_s1 = inlined_call_operand.hbm [shape: f32[16,96], index: 1, kind: input, shape index: {}]   ;;  %s244_s2 = inlined_call_operand.vmem [shape: f32[1,96], index: 2, kind: input, shape index: {}]   ;;  %s245_s3 = inlined_call_operand.hbm [shape: f32[16,96], index: 3, kind: output, shape index: {}]  }
   0x1   :  { %9 = vsyncpa [#allocation6], 0 }
   0x2   :  { %10 = vsyncpa [#allocation4], 0  ;;  %s15_s14 = sshll.u32 %s242_s0, 4  ;;  %s196_s15 = smov [#allocation2]   ;;  %s16_s14 = int_to_ptr.hbm [resolvable:$true] %s15_s14 }
   0x3   :  { %s17_s16 = sshll.u32 %s196_s15, 4  ;;  %s28_s19 = sshll.u32 %s243_s1, 4  ;;  %s18_s16 = int_to_ptr.vmem [resolvable:$true] %s17_s16  ;;  %s29_s19 = int_to_ptr.hbm [resolvable:$true] %s28_s19 }
   0x4   :  { %s197_s20 = smov 128   ;;  %s198_s21 = smov 8  }
   0x5   :  { %23 = dma.hbm_to_vmem [thread:$0]  %s16_s14, 256, %s18_s16, [#allocation3], %s197_s20, %s197_s20, %s198_s21  }
   0x6   :  { %s199_s22 = smov [#allocation5]  }
   0x7   :  { %s30_s23 = sshll.u32 %s199_s22, 4  ;;  %s31_s23 = int_to_ptr.vmem [resolvable:$true] %s30_s23 }
   0x8   :  { %36 = dma.hbm_to_vmem [thread:$0]  %s29_s19, 256, %s31_s23, [#allocation6], %s197_s20, %s197_s20, %s198_s21  }
   0x9   :  { %190 = dma.done.wait [#allocation3], 256  }
   0xa   :  { %191 = vsyncadd [#allocation3], 4294967040 }
   0xb   :  { %192 = dma.done.wait [#allocation6], 256  }
   0xc   :  { %193 = vsyncadd [#allocation6], 4294967040  ;;  %v50_v0 = vld [vmem:[#allocation5 + $0x8] sm:$0xff]  ;;  %v49_v1 = vld [vmem:[#allocation5] sm:$0xff]  ;;  %vm55_vm0 = vcmask 130048   ;;  %s200_s24 = smov [#allocation7]  }
   0xd   :  { %76 = vmatpush.msra.mxu0 %v50_v0  ;;  %110 = vmatpush.msra.mxu1 %v50_v0  ;;  %v47_v2 = vld [vmem:[#allocation2] sm:$0xff]  ;;  %v48_v3 = vld [vmem:[#allocation2 + $0x8] sm:$0xff]  ;;  %s92_s25 = sshll.u32 %s200_s24, 4  ;;  %s94_s28 = sshll.u32 %s245_s3, 4  ;;  %vm85_vm1 = vcmask 785408   ;;  %s93_s25 = int_to_ptr.vmem [resolvable:$true] %s92_s25  ;;  %s95_s28 = int_to_ptr.hbm [resolvable:$true] %s94_s28 }
   0xe   :  { %v117_v4 = vld [vmem:[%s244_s2] ss:$0 sm:$0xff] }
   0xf   :  { %77 = vmatpush.msra.mxu0 %v49_v1  ;;  %111 = vmatpush.msra.mxu1 %v49_v1 }
  0x10   :  { %108 = vmatmul.msk.f32.vlgmr.msra.gmra.mxu0 %vm55_vm0, %v47_v2  ;;  %109 = vmatmul.msk.f32.vlgmr.msra.gmra.mxu1 %vm55_vm0, %v48_v3 }
  0x8d   :  { %v79_v5 = vpop.f32.mrf.mxu0  ;;  %v82_v6 = vpop.f32.mrf.mxu1 }
  0x8e   :  { %v80_v7 = vadd.f32 %v117_v4, %v79_v5  ;;  %v83_v8 = vadd.f32 %v117_v4, %v82_v6 }
  0x90   :  { %86 = vst.msk [vmem:[#allocation7] sm:$0xff] %vm85_vm1, %v80_v7 }
  0x91   :  { %87 = vst.msk [vmem:[#allocation7 + $0x8] sm:$0xff] %vm85_vm1, %v83_v8 }
  0x92   :  { %100 = dma.vmem_to_hbm [thread:$0]  %s93_s25, 256, %s95_s28, [#allocation4], %s197_s20, %s197_s20, %s198_s21  }
  0x93   :  { %194 = dma.done.wait [#allocation4], 256  }
  0x94   :  { %195 = vsyncadd [#allocation4], 4294967040 }
  0x95   :  { %105 = vsyncpa [#allocation3], 1 }
  0x96   :  { %106 = vsyncpa [#allocation6], 1 }
  0x97   :  { %107 = vsyncpa [#allocation4], 1 }

</bundles_post_ra>
